<compile_context>
chip_gen: v7x
topology: tpu7x:2x2x1
jax: 0.10.0
libtpu: 0.0.40
codegen_flags: <defaults>
</compile_context>

<pallas_src>
import math
from functools import partial

import jax
import jax.numpy as jnp
from jax.experimental import pallas as pl
from jax.experimental.pallas import tpu as pltpu


def _round_up(v: int, m: int) -> int:
    return ((v + m - 1) // m) * m


# Padded coordinate cells use this sentinel: sentinel^2 * (-0.5/var) is a huge
# negative number, so exp underflows to 0 and the threshold keeps it at 0.
_PAD_SENTINEL = 1e6

# Masks per grid step.  Working set per mask in VMEM (f32, (8,128)-tiled):
#   out 8 KiB + x 4 KiB + y 8 KiB = 20 KiB; double-buffered -> ~40 KiB.
# TB=128 -> ~5 MiB, safe under v5e's 16 MiB scoped-VMEM default and v7x's
# 32 MiB default / 64 MiB physical.
_MAX_MASKS_PER_STEP = 128


def _gaussian_mask_kernel(p_ref, x_ref, y_ref, o_ref):
    """One grid step == TB masks.

    p_ref (SMEM, f32[3]): [-0.5/var_x, -0.5/var_y, threshold]  (shared scalars)
    x_ref (VMEM, f32[TB, 1, nx_pad]):  x coordinates, lane-dense.
    y_ref (VMEM, f32[TB, ny_pad, 1]):  y coordinates, along sublanes.
    o_ref (VMEM, f32[TB, ny_pad, nx_pad]): lane-dense padded masks.
    """
    nhvx = p_ref[0]                         # -0.5 / var_x (pre-folded in wrapper)
    nhvy = p_ref[1]                         # -0.5 / var_y
    thr = p_ref[2]

    x = x_ref[...]                          # (TB, 1, nx_pad)
    y = y_ref[...]                          # (TB, ny_pad, 1)

    # Factored exponential: small per-axis exps (EUP), then a broadcast
    # outer-product multiply (VPU) to build the 2-D mask.
    ex = jnp.exp(x * x * nhvx)              # (TB, 1, nx_pad)
    ey = jnp.exp(y * y * nhvy)              # (TB, ny_pad, 1)
    q = ey * ex                             # (TB, ny_pad, nx_pad)

    o_ref[...] = jnp.where(q >= thr, q, jnp.zeros_like(q))


@partial(jax.jit,
         static_argnames=("threshold", "log_min_var_x", "log_min_var_y",
                          "max_masks_per_step"))
def _gaussian_mask_forward(log_var_x, log_var_y, x_coords, y_coords, *,
                           threshold, log_min_var_x, log_min_var_y,
                           max_masks_per_step=_MAX_MASKS_PER_STEP):
    """x_coords: f32[B, nx], y_coords: f32[B, ny] -> f32[B, ny, nx]."""
    batch, nx = x_coords.shape
    _, ny = y_coords.shape

    nx_pad = max(128, _round_up(nx, 128))       # lane-dense output width
    ny_pad = max(8, _round_up(ny, 8))           # sublane-aligned output height

    if batch <= max_masks_per_step:
        tb = batch
        b_pad = batch
    else:
        tb = max_masks_per_step
        b_pad = _round_up(batch, tb)

    # --- scalar preamble: done in XLA (fused under jit), not in the kernel ---
    lvx = jnp.maximum(log_var_x, jnp.float32(log_min_var_x))
    lvy = jnp.maximum(log_var_y, jnp.float32(log_min_var_y))
    var_x = jnp.maximum(jnp.exp(lvx), 1e-12)
    var_y = jnp.maximum(jnp.exp(lvy), 1e-12)
    params = jnp.stack([-0.5 / var_x, -0.5 / var_y,
                        jnp.float32(threshold)]).astype(jnp.float32)

    # Lean coordinate inputs; sentinel padding so padded cells -> 0 after
    # exp + threshold (belt-and-braces; padded region is also sliced off).
    xp = jnp.pad(x_coords.astype(jnp.float32),
                 ((0, b_pad - batch), (0, nx_pad - nx)),
                 constant_values=_PAD_SENTINEL)[:, None, :]      # (b_pad,1,nx_pad)
    yp = jnp.pad(y_coords.astype(jnp.float32),
                 ((0, b_pad - batch), (0, ny_pad - ny)),
                 constant_values=_PAD_SENTINEL)[:, :, None]      # (b_pad,ny_pad,1)

    out = pl.pallas_call(
        _gaussian_mask_kernel,
        out_shape=jax.ShapeDtypeStruct((b_pad, ny_pad, nx_pad), jnp.float32),
        grid=(b_pad // tb,),
        in_specs=[
            pl.BlockSpec(memory_space=pltpu.MemorySpace.SMEM),   # shared scalars
            pl.BlockSpec((tb, 1, nx_pad), lambda b: (b, 0, 0)),
            pl.BlockSpec((tb, ny_pad, 1), lambda b: (b, 0, 0)),
        ],
        out_specs=pl.BlockSpec((tb, ny_pad, nx_pad), lambda b: (b, 0, 0)),
        compiler_params=pltpu.CompilerParams(
            dimension_semantics=("parallel",)),                  # 2 TCs on v7x
    )(params, xp, yp)

    # Slice back to the logical shape.  Under jit this fuses with the caller;
    # consumers that can accept the padded (ny_pad, nx_pad) layout may skip it.
    return out[:batch, :ny, :nx]


class GaussianMask2D:
    """JAX/Pallas port of the PyTorch GaussianMask2D module."""

    def __init__(self,
                 initial_sigma_x: float = 0.5,
                 initial_sigma_y: float = 0.5,
                 threshold: float = 0.1,
                 max_kernel_span_x: int = 11,
                 max_kernel_span_y: int = 11) -> None:
        max_threshold = 0.5
        if not 0.0 < threshold < max_threshold:
            raise ValueError(f"Threshold must be in (0.0, 0.5), got {threshold}")
        if max_kernel_span_x <= 1 or max_kernel_span_y <= 1:
            raise ValueError("max_kernel_span_x and max_kernel_span_y must be > 1")
        if max_kernel_span_x % 2 == 0 or max_kernel_span_y % 2 == 0:
            raise ValueError("max_kernel_span_x and max_kernel_span_y should be odd")
        if initial_sigma_x <= 0.0 or initial_sigma_y <= 0.0:
            raise ValueError("initial sigmas must be positive")

        self.threshold = float(threshold)
        self.log_threshold = math.log(self.threshold)
        self.max_kernel_span_x = int(max_kernel_span_x)
        self.max_kernel_span_y = int(max_kernel_span_y)

        step_size_x = 2.0 / (max_kernel_span_x - 1)
        step_size_y = 2.0 / (max_kernel_span_y - 1)
        self.log_min_var_x = math.log(step_size_x ** 2 / (-2.0 * math.log(threshold)))
        self.log_min_var_y = math.log(step_size_y ** 2 / (-2.0 * math.log(threshold)))
        self.min_span_pixels = 3.0

        initial_var_x = initial_sigma_x ** 2
        initial_var_y = initial_sigma_y ** 2
        # learnable scalar parameters, deterministically initialized
        self.log_var_x = jnp.float32(math.log(initial_var_x))
        self.log_var_y = jnp.float32(math.log(initial_var_y))
        self.initial_size_x = math.sqrt(-2.0 * initial_var_x * self.log_threshold)
        self.initial_size_y = math.sqrt(-2.0 * initial_var_y * self.log_threshold)

    def apply_var_constraints(self) -> None:
        """Functional equivalent of the PyTorch in-place parameter clamp."""
        # TODO(synk): PyTorch mutates nn.Parameter data in place; here we
        # reassign the (immutable) jnp scalars, and the forward also applies
        # the same clamp internally so results match either way.
        self.log_var_x = jnp.maximum(self.log_var_x, jnp.float32(self.log_min_var_x))
        self.log_var_y = jnp.maximum(self.log_var_y, jnp.float32(self.log_min_var_y))

    def get_mask_size(self) -> jnp.ndarray:
        """Pure-jnp port of get_mask_size (tiny scalar math, no kernel needed)."""
        hw_x = jnp.sqrt(-2.0 * jnp.exp(self.log_var_x) * self.log_threshold)
        hw_y = jnp.sqrt(-2.0 * jnp.exp(self.log_var_y) * self.log_threshold)
        size_x = hw_x / self.initial_size_x * self.max_kernel_span_x
        size_y = hw_y / self.initial_size_y * self.max_kernel_span_y
        final_x = jnp.clip(size_x, self.min_span_pixels, float(self.max_kernel_span_x))
        final_y = jnp.clip(size_y, self.min_span_pixels, float(self.max_kernel_span_y))
        return jnp.stack((final_y, final_x), axis=0)

    def forward_batched(self, x_coords: jnp.ndarray, y_coords: jnp.ndarray) -> jnp.ndarray:
        """Batch of masks in one pallas_call.  x: (B, nx), y: (B, ny) -> (B, ny, nx)."""
        assert x_coords.ndim == 2 and y_coords.ndim == 2
        assert x_coords.shape[0] == y_coords.shape[0]
        return _gaussian_mask_forward(
            self.log_var_x, self.log_var_y, x_coords, y_coords,
            threshold=self.threshold,
            log_min_var_x=self.log_min_var_x,
            log_min_var_y=self.log_min_var_y)

    def forward_xla(self, x_coords: jnp.ndarray, y_coords: jnp.ndarray) -> jnp.ndarray:
        """Pure-XLA fallback; lowest-latency path for a single tiny mask when the
        caller cannot batch (the Pallas kernel is the main path)."""
        return _reference(self, x_coords, y_coords)

    def __call__(self, x_coords: jnp.ndarray, y_coords: jnp.ndarray) -> jnp.ndarray:
        assert x_coords.ndim == 1 and y_coords.ndim == 1
        # Single mask == batch of 1 through the Pallas kernel.  For best
        # throughput batch many masks via forward_batched.
        return self.forward_batched(x_coords[None, :], y_coords[None, :])[0]


def _reference(module: GaussianMask2D, x_coords, y_coords):
    """Pure-jnp reference mirroring the PyTorch forward."""
    log_var_x = jnp.maximum(module.log_var_x, module.log_min_var_x)
    log_var_y = jnp.maximum(module.log_var_y, module.log_min_var_y)
    var_x = jnp.maximum(jnp.exp(log_var_x), 1e-12)
    var_y = jnp.maximum(jnp.exp(log_var_y), 1e-12)
    xg = x_coords[None, :]
    yg = y_coords[:, None]
    q = jnp.exp(-0.5 * (yg ** 2 / var_y + xg ** 2 / var_x))
    return jnp.where(q >= module.threshold, q, jnp.zeros_like(q))


if __name__ == "__main__":
    key = jax.random.PRNGKey(0)
    kx, ky, kbx, kby = jax.random.split(key, 4)

    span_x, span_y = 11, 11
    module = GaussianMask2D(initial_sigma_x=0.5, initial_sigma_y=0.5,
                            threshold=0.1,
                            max_kernel_span_x=span_x, max_kernel_span_y=span_y)

    # --- single-mask path (matches PyTorch forward) ---
    x_coords = jnp.sort(jax.random.uniform(kx, (span_x,), jnp.float32, -1.0, 1.0))
    y_coords = jnp.sort(jax.random.uniform(ky, (span_y,), jnp.float32, -1.0, 1.0))

    mask = module(x_coords, y_coords)
    jax.block_until_ready(mask)

    ref = _reference(module, x_coords, y_coords)
    assert mask.shape == (span_y, span_x)
    assert jnp.allclose(mask, ref, atol=2e-6, rtol=1e-5)

    # --- batched path: many masks in one batch-blocked pallas_call ---
    B = 5
    xb = jnp.sort(jax.random.uniform(kbx, (B, span_x), jnp.float32, -1.0, 1.0), axis=-1)
    yb = jnp.sort(jax.random.uniform(kby, (B, span_y), jnp.float32, -1.0, 1.0), axis=-1)

    masks = module.forward_batched(xb, yb)
    jax.block_until_ready(masks)
    assert masks.shape == (B, span_y, span_x)

    refs = jax.vmap(lambda xc, yc: _reference(module, xc, yc))(xb, yb)
    assert jnp.allclose(masks, refs, atol=2e-6, rtol=1e-5)

    print("KERNEL_OK")
</pallas_src>

<mosaic_0001>
module attributes {stable_mosaic.version = 11 : i64} {
  func.func @_gaussian_mask_kernel(%arg0: i32, %arg1: memref<3xf32, #tpu.memory_space<smem>>, %arg2: memref<1x1x128xf32, #tpu.memory_space<vmem>>, %arg3: memref<1x16x1xf32, #tpu.memory_space<vmem>>, %arg4: memref<1x16x128xf32, #tpu.memory_space<vmem>>) attributes {dimension_semantics = [#tpu.dimension_semantics<parallel>], iteration_bounds = array<i64: 1>, scalar_prefetch = 0 : i64, scratch_operands = 0 : i64, tpu.core_type = #tpu.core_type<tc>, window_params = [{transform_indices = @transform_0, window_bounds = array<i64: 3>}, {transform_indices = @transform_1, window_bounds = array<i64: 1, 1, 128>}, {transform_indices = @transform_2, window_bounds = array<i64: 1, 16, 1>}, {transform_indices = @transform_3, window_bounds = array<i64: 1, 16, 128>}]} {
    %c0 = arith.constant 0 : index
    %0 = memref.load %arg1[%c0] : memref<3xf32, #tpu.memory_space<smem>>
    %c1 = arith.constant 1 : index
    %1 = memref.load %arg1[%c1] : memref<3xf32, #tpu.memory_space<smem>>
    %c2 = arith.constant 2 : index
    %2 = memref.load %arg1[%c2] : memref<3xf32, #tpu.memory_space<smem>>
    %c0_0 = arith.constant 0 : index
    %c0_1 = arith.constant 0 : index
    %c0_2 = arith.constant 0 : index
    %3 = vector.load %arg2[%c0_0, %c0_1, %c0_2] : memref<1x1x128xf32, #tpu.memory_space<vmem>>, vector<1x1x128xf32>
    %c0_3 = arith.constant 0 : index
    %c0_4 = arith.constant 0 : index
    %c0_5 = arith.constant 0 : index
    %4 = vector.load %arg3[%c0_3, %c0_4, %c0_5] : memref<1x16x1xf32, #tpu.memory_space<vmem>>, vector<1x16x1xf32>
    %5 = arith.mulf %3, %3 : vector<1x1x128xf32>
    %6 = vector.broadcast %0 : f32 to vector<1x1x128xf32>
    %7 = arith.mulf %5, %6 : vector<1x1x128xf32>
    %8 = math.exp %7 : vector<1x1x128xf32>
    %9 = arith.mulf %4, %4 : vector<1x16x1xf32>
    %10 = vector.broadcast %1 : f32 to vector<1x16x1xf32>
    %11 = arith.mulf %9, %10 : vector<1x16x1xf32>
    %12 = math.exp %11 : vector<1x16x1xf32>
    %13 = vector.broadcast %12 : vector<1x16x1xf32> to vector<1x16x128xf32>
    %14 = vector.broadcast %8 : vector<1x1x128xf32> to vector<1x16x128xf32>
    %15 = arith.mulf %13, %14 : vector<1x16x128xf32>
    %16 = vector.broadcast %2 : f32 to vector<1x16x128xf32>
    %17 = arith.cmpf oge, %15, %16 : vector<1x16x128xf32>
    %cst = arith.constant 0.000000e+00 : f32
    %18 = vector.broadcast %cst : f32 to vector<1x16x128xf32>
    %19 = arith.select %17, %15, %18 : vector<1x16x128xi1>, vector<1x16x128xf32>
    %c0_6 = arith.constant 0 : index
    %c0_7 = arith.constant 0 : index
    %c0_8 = arith.constant 0 : index
    %20 = vector.load %arg4[%c0_6, %c0_7, %c0_8] : memref<1x16x128xf32, #tpu.memory_space<vmem>>, vector<1x16x128xf32>
    tpu.vector_store %arg4[%c0_6, %c0_7, %c0_8], %19 {strides = array<i32>} : memref<1x16x128xf32, #tpu.memory_space<vmem>>, vector<1x16x128xf32>,
    return
  }
  func.func @transform_0(%arg0: i32) -> i32 {
    %c0_i32 = arith.constant 0 : i32
    %c0_i32_0 = arith.constant 0 : i32
    return %c0_i32 : i32
  }
  func.func @transform_1(%arg0: i32) -> (i32, i32, i32) {
    %c0_i32 = arith.constant 0 : i32
    %c0_i32_0 = arith.constant 0 : i32
    %c0_i32_1 = arith.constant 0 : i32
    return %arg0, %c0_i32, %c0_i32_0 : i32, i32, i32
  }
  func.func @transform_2(%arg0: i32) -> (i32, i32, i32) {
    %c0_i32 = arith.constant 0 : i32
    %c0_i32_0 = arith.constant 0 : i32
    %c0_i32_1 = arith.constant 0 : i32
    return %arg0, %c0_i32, %c0_i32_0 : i32, i32, i32
  }
  func.func @transform_3(%arg0: i32) -> (i32, i32, i32) {
    %c0_i32 = arith.constant 0 : i32
    %c0_i32_0 = arith.constant 0 : i32
    %c0_i32_1 = arith.constant 0 : i32
    return %arg0, %c0_i32, %c0_i32_0 : i32, i32, i32
  }
}

</mosaic_0001>

<bundles_post_ra>
// kernel: _gaussian_mask_forward.1
= control target key start
LH: loop header
LB: loop body
LE: loop exit
PB: predicated region body
PF: predicated region fallthrough
CT: control target
= control target key end

     0   :  { %8 = vsyncpa [#allocation3], 0  ;;  %s142_s0 = inlined_call_operand.vmem [shape: f32[3], index: 0, kind: input, shape index: {}]   ;;  %s143_s1 = inlined_call_operand.vmem [shape: f32[1,1,128], index: 1, kind: input, shape index: {}]   ;;  %s144_s2 = inlined_call_operand.vmem [shape: f32[1,16,1], index: 2, kind: input, shape index: {}]   ;;  %s145_s3 = inlined_call_operand.vmem [shape: f32[1,16,128], index: 3, kind: output, shape index: {}]  }
   0x1   :  { %s15_s14 = sshll.u32 %s142_s0, 4  ;;  %s16_s14 = int_to_ptr.vmem [resolvable:$true] %s15_s14 }
   0x2   :  { %s88_s15 = scalar_lea.vmem %s16_s14, 16  ;;  %p93_p1 = scmp.lt.s32.totalorder %s16_s14, %s16_s14 }
   0x3   :  { %p89_p0 = scmp.ne.s32.totalorder %s16_s14, %s88_s15  ;;  %p94_p2 = scmp.lt.s32.totalorder %s88_s15, %s88_s15 }
   0x5   :  { %p95_p3 = por %p94_p2, %p93_p1 }
   0x7   :  { %p96_p4 = pnand %p95_p3, %p89_p0 }
   0x9   :  { %99 = shalt.err (!%p96_p4)
}
   0xa   :  { %s102_s16 = smov [#allocation2]  }
   0xb   :  { %18 = dma.vmem_to_smem %s16_s14, 16, %s102_s16, [#allocation3]  }
   0xc   :  { %100 = dma.done.wait [#allocation3], 16  }
   0xd   :  { %101 = vsyncadd [#allocation3], 4294967280 }
   0xe   :  { %26 = sfence }
   0xf   :  { %s77_s17 = sld [smem:[#allocation2 + $0x1]]  ;;  %v31_v0 = vld [vmem:[%s144_s2] sm:$0xff]  ;;  %v32_v1 = vld [vmem:[%s144_s2 + $0x8] sm:$0xff]  ;;  %v103_v2 = vmov 0   ;;  %s27_s21 = sld [smem:[#allocation2]]  ;;  %v58_v17 = vlaneseq }
  0x10   :  { %81 = vset.pattern.permute.xlu0 %v103_v2  ;;  %v38_v3 = vmul.f32 %v31_v0, %v31_v0  ;;  %v39_v4 = vmul.f32 %v32_v1, %v32_v1  ;;  %v30_v12 = vld [vmem:[%s143_s1] sm:$0x1]  ;;  %s78_s2 = sld [smem:[#allocation2 + $0x2]] }
  0x11   :  { %v33_v13 = vmul.f32 %v30_v12, %v30_v12  ;;  %v59_v18 = vshrl.u32 %v58_v17, 7 }
  0x13   :  { %v60_v19 = vsub.s32 0, %v59_v18 }
  0x15   :  { %v40_v5 = vstv %s77_s17  ;;  %v34_v14 = vstv %s27_s21 }
  0x16   :  { %v41_v6 = vmul.f32 %v40_v5, %v38_v3  ;;  %v42_v7 = vmul.f32 %v40_v5, %v39_v4  ;;  %v35_v15 = vmul.f32 %v34_v14, %v33_v13  ;;  %v65_v22 = vstv %s78_s2 }
  0x18   :  { %v43_v8 = vmul.f32 1.442695, %v41_v6  ;;  %v45_v9 = vmul.f32 1.442695, %v42_v7  ;;  %v36_v16 = vmul.f32 1.442695, %v35_v15 }
  0x1a   :  { %82 = vpow2.f32 %v43_v8 }
  0x1b   :  { %84 = vpow2.f32 %v45_v9 }
  0x1c   :  { %86 = vpow2.f32 %v36_v16 }
  0x24   :  { %v83_v10 = vpop.eup %82 }
  0x25   :  { %49 = vperm.xlu0 %81, %v83_v10   ;;  %v85_v11 = vpop.eup %84 }
  0x26   :  { %v87_v20 = vpop.eup %86 }
  0x27   :  { %v61_v21 = vrot.slane %v87_v20, %v60_v19 }
  0x29   :  { %54 = vperm.xlu0 %81, %v85_v11  }
  0xa4   :  { %v50_v23 = vpop.permute.xlu0 %49 }
  0xa5   :  { %v63_v24 = vmul.f32 %v61_v21, %v50_v23 }
  0xa7   :  { %vm66_vm0 = vcmp.ge.f32.partialorder %v63_v24, %v65_v22 }
  0xa8   :  { %v68_v25 = vsel %vm66_vm0, %v63_v24, 0.0  ;;  %v55_v26 = vpop.permute.xlu0 %54 }
  0xa9   :  { %70 = vst [vmem:[%s145_s3] sm:$0xff] %v68_v25  ;;  %v64_v27 = vmul.f32 %v61_v21, %v55_v26 }
  0xab   :  { %vm67_vm1 = vcmp.ge.f32.partialorder %v64_v27, %v65_v22 }
  0xac   :  { %v69_v28 = vsel %vm67_vm1, %v64_v27, 0.0 }
  0xad   :  { %71 = vst [vmem:[%s145_s3 + $0x8] sm:$0xff] %v69_v28 }
  0xae   :  { %76 = vsyncpa [#allocation3], 1 }

</bundles_post_ra>
